<compile_context>
chip_gen: v6e
topology: v6e:2x2x1
jax: 0.10.0
libtpu: 0.0.40
codegen_flags: <defaults>
</compile_context>

<pallas_src>
import math

import jax
import jax.numpy as jnp
from jax import lax
from jax.experimental import pallas as pl
from jax.experimental.pallas import tpu as pltpu

# ---- model hyper-parameters (small, consistent with the module) ----
B = 2          # batch
S = 8          # sequence length
D_MODEL = 32   # d_model
NUM_HEADS = 4
D_K = D_MODEL // NUM_HEADS
D_FF = 64
EPS = 1e-6

# Packed-weight column offsets: [wq | wk | wv | wo | w1]
_QKV_END = 3 * D_MODEL            # 96
_WO_END = _QKV_END + D_MODEL      # 128
_W1_END = _WO_END + D_FF          # 192
# Packed-bias column offsets:   [bq | bk | bv | bo | b1 | b2]
_B2_END = _W1_END + D_MODEL       # 224


def _layer_norm(t):
    # PyTorch LayerNormalization: mean / unbiased std over last dim,
    # alpha=1, bias=0, denominator (std + eps).
    mean = jnp.mean(t, axis=-1, keepdims=True)
    c = t - mean
    var = jnp.sum(c * c, axis=-1, keepdims=True) * (1.0 / (D_MODEL - 1))
    return c * pl.reciprocal(jnp.sqrt(var) + EPS, approx=False)


def encoder_block_kernel(x_ref, mask_ref, w_in_ref, w2_ref, b_ref,
                         out_ref, attn_ref):
    # x_ref / out_ref: (B*S, D_MODEL); mask_ref: (B*S, S) int32.
    x = x_ref[...]

    # Additive mask, computed once for the whole batch (hoisted out of loops).
    neg = jnp.where(mask_ref[...] == 0, jnp.float32(-1e9), jnp.float32(0.0))

    # ---------- residual connection 0: self-attention on norm(x) ----------
    xn = _layer_norm(x)
    # Fused QKV projection: (16,32) @ (32,96) on the MXU.
    qkv = jnp.dot(xn, w_in_ref[:, 0:_QKV_END],
                  preferred_element_type=jnp.float32) + b_ref[:, 0:_QKV_END]

    scale = 1.0 / math.sqrt(D_K)
    for b in range(B):                 # static unrolled loops (B*H = 8 heads)
        r = b * S
        neg_b = neg[r:r + S, :]        # (S, S) additive mask for this batch
        for h in range(NUM_HEADS):
            c = h * D_K
            q_h = qkv[r:r + S, c:c + D_K]
            k_h = qkv[r:r + S, D_MODEL + c:D_MODEL + c + D_K]
            v_h = qkv[r:r + S, 2 * D_MODEL + c:2 * D_MODEL + c + D_K]
            # scores[q, k] = <q_h[q], k_h[k]> / sqrt(d_k) + mask
            s = lax.dot_general(q_h, k_h, (((1,), (1,)), ((), ())),
                                preferred_element_type=jnp.float32)
            s = s * scale + neg_b
            # stable softmax over the last dim (matches torch.softmax)
            s = s - jnp.max(s, axis=-1, keepdims=True)
            p = jnp.exp(s)
            p = p * pl.reciprocal(jnp.sum(p, axis=-1, keepdims=True),
                                  approx=False)
            # Write the head output directly into the VMEM scratch slot
            # (replaces the 4-way lane concatenate).
            attn_ref[r:r + S, c:c + D_K] = jnp.dot(
                p, v_h, preferred_element_type=jnp.float32)

    # Output projection over the whole batch at once: (16,32) @ (32,32).
    attn = jnp.dot(attn_ref[...], w_in_ref[:, _QKV_END:_WO_END],
                   preferred_element_type=jnp.float32) \
        + b_ref[:, _QKV_END:_WO_END]
    # TODO(synk): dropout is identity (eval mode); no RNG applied.
    x = x + attn

    # ---------- residual connection 1: feed-forward on norm(x) ----------
    xn2 = _layer_norm(x)
    h1 = jnp.dot(xn2, w_in_ref[:, _WO_END:_W1_END],
                 preferred_element_type=jnp.float32) + b_ref[:, _WO_END:_W1_END]
    h1 = jnp.maximum(h1, 0.0)                                  # relu
    y = jnp.dot(h1, w2_ref[...],
                preferred_element_type=jnp.float32) + b_ref[:, _W1_END:_B2_END]

    out_ref[...] = x + y


def encoder_block(x, src_mask, params):
    """x: (B, S, D_MODEL) f32, src_mask: (B, S, S) i32, params: dict of f32."""
    # Fold batch into the matmul M dimension; flatten mask the same way.
    x2 = x.reshape(B * S, D_MODEL)
    m2 = src_mask.reshape(B * S, S)
    # Pack weights/biases into lane-concatenated buffers (5 operands total
    # instead of 14 -> far fewer per-call DMAs, and a fused QKV matmul).
    w_in = jnp.concatenate(
        [params["wq"], params["wk"], params["wv"], params["wo"], params["w1"]],
        axis=1)                                                 # (32, 192)
    b_all = jnp.concatenate(
        [params["bq"], params["bk"], params["bv"], params["bo"],
         params["b1"], params["b2"]], axis=1)                   # (1, 224)

    out2 = pl.pallas_call(
        encoder_block_kernel,
        out_shape=jax.ShapeDtypeStruct((B * S, D_MODEL), jnp.float32),
        scratch_shapes=[pltpu.VMEM((B * S, D_MODEL), jnp.float32)],
    )(x2, m2, w_in, params["w2"], b_all)
    return out2.reshape(B, S, D_MODEL)


# ---------------- pure-JAX reference (mirrors PyTorch semantics) ----------------
def _reference(x, src_mask, p):
    def ln(t):
        mean = jnp.mean(t, axis=-1, keepdims=True)
        var = jnp.sum((t - mean) ** 2, axis=-1, keepdims=True) / (t.shape[-1] - 1)
        return (t - mean) / (jnp.sqrt(var) + EPS)

    def mha(t, mask):
        q = t @ p["wq"] + p["bq"]
        k = t @ p["wk"] + p["bk"]
        v = t @ p["wv"] + p["bv"]
        def split(a):  # (B,S,D) -> (B,H,S,dk)
            return a.reshape(B, S, NUM_HEADS, D_K).transpose(0, 2, 1, 3)
        q, k, v = split(q), split(k), split(v)
        sc = jnp.einsum("bhqd,bhkd->bhqk", q, k) / math.sqrt(D_K)
        sc = jnp.where(mask[:, None, :, :] == 0, -1e9, sc)
        sc = jax.nn.softmax(sc, axis=-1)
        o = jnp.einsum("bhqk,bhkd->bhqd", sc, v)
        o = o.transpose(0, 2, 1, 3).reshape(B, S, D_MODEL)
        return o @ p["wo"] + p["bo"]

    def ffn(t):
        return jnp.maximum(t @ p["w1"] + p["b1"], 0.0) @ p["w2"] + p["b2"]

    x = x + mha(ln(x), src_mask)
    x = x + ffn(ln(x))
    return x


def _init_params(key):
    ks = jax.random.split(key, 6)
    s = 0.1
    return {
        "wq": s * jax.random.normal(ks[0], (D_MODEL, D_MODEL), jnp.float32),
        "bq": jnp.full((1, D_MODEL), 0.01, jnp.float32),
        "wk": s * jax.random.normal(ks[1], (D_MODEL, D_MODEL), jnp.float32),
        "bk": jnp.full((1, D_MODEL), -0.01, jnp.float32),
        "wv": s * jax.random.normal(ks[2], (D_MODEL, D_MODEL), jnp.float32),
        "bv": jnp.full((1, D_MODEL), 0.02, jnp.float32),
        "wo": s * jax.random.normal(ks[3], (D_MODEL, D_MODEL), jnp.float32),
        "bo": jnp.full((1, D_MODEL), -0.02, jnp.float32),
        "w1": s * jax.random.normal(ks[4], (D_MODEL, D_FF), jnp.float32),
        "b1": jnp.full((1, D_FF), 0.03, jnp.float32),
        "w2": s * jax.random.normal(ks[5], (D_FF, D_MODEL), jnp.float32),
        "b2": jnp.full((1, D_MODEL), -0.03, jnp.float32),
    }


if __name__ == "__main__":
    key = jax.random.PRNGKey(0)
    kx, km, kp = jax.random.split(key, 3)

    x = jax.random.normal(kx, (B, S, D_MODEL), jnp.float32)
    src_mask = (jax.random.uniform(km, (B, S, S)) > 0.2).astype(jnp.int32)
    params = _init_params(kp)

    out = encoder_block(x, src_mask, params)
    out = jax.block_until_ready(out)

    ref = _reference(x, src_mask, params)
    assert out.shape == (B, S, D_MODEL)
    assert jnp.allclose(out, ref, atol=1e-4, rtol=1e-4), (
        f"max abs diff {jnp.max(jnp.abs(out - ref))}")

    print("KERNEL_OK")
</pallas_src>

<mosaic_0001>
module attributes {stable_mosaic.version = 11 : i64} {
  func.func @encoder_block_kernel(%arg0: memref<16x32xf32, #tpu.memory_space<vmem>>, %arg1: memref<16x8xi32, #tpu.memory_space<vmem>>, %arg2: memref<32x192xf32, #tpu.memory_space<vmem>>, %arg3: memref<64x32xf32, #tpu.memory_space<vmem>>, %arg4: memref<1x224xf32, #tpu.memory_space<vmem>>, %arg5: memref<16x32xf32, #tpu.memory_space<vmem>>, %arg6: memref<16x32xf32, #tpu.memory_space<vmem>>) attributes {dimension_semantics = [], scalar_prefetch = 0 : i64, scratch_operands = 1 : i64, tpu.core_type = #tpu.core_type<tc>} {
    %c0 = arith.constant 0 : index
    %c0_0 = arith.constant 0 : index
    %0 = vector.load %arg0[%c0, %c0_0] : memref<16x32xf32, #tpu.memory_space<vmem>>, vector<16x32xf32>
    %c0_1 = arith.constant 0 : index
    %c0_2 = arith.constant 0 : index
    %1 = vector.load %arg1[%c0_1, %c0_2] : memref<16x8xi32, #tpu.memory_space<vmem>>, vector<16x8xi32>
    %c0_i32 = arith.constant 0 : i32
    %2 = vector.broadcast %c0_i32 : i32 to vector<16x8xi32>
    %3 = arith.cmpi eq, %1, %2 : vector<16x8xi32>
    %cst = arith.constant -1.000000e+09 : f32
    %cst_3 = arith.constant 0.000000e+00 : f32
    %4 = vector.broadcast %cst : f32 to vector<16x8xf32>
    %5 = vector.broadcast %cst_3 : f32 to vector<16x8xf32>
    %6 = arith.select %3, %4, %5 : vector<16x8xi1>, vector<16x8xf32>
    %cst_4 = arith.constant dense<0.000000e+00> : vector<16xf32>
    %7 = vector.multi_reduction <add>, %0, %cst_4 [1] : vector<16x32xf32> to vector<16xf32>
    %8 = vector.shape_cast %7 : vector<16xf32> to vector<16x1xf32>
    %cst_5 = arith.constant 3.200000e+01 : f32
    %9 = vector.broadcast %cst_5 : f32 to vector<16x1xf32>
    %10 = arith.divf %8, %9 : vector<16x1xf32>
    %11 = vector.broadcast %10 : vector<16x1xf32> to vector<16x32xf32>
    %12 = arith.subf %0, %11 : vector<16x32xf32>
    %13 = arith.mulf %12, %12 : vector<16x32xf32>
    %cst_6 = arith.constant dense<0.000000e+00> : vector<16xf32>
    %14 = vector.multi_reduction <add>, %13, %cst_6 [1] : vector<16x32xf32> to vector<16xf32>
    %15 = vector.shape_cast %14 : vector<16xf32> to vector<16x1xf32>
    %cst_7 = arith.constant 0.0322580636 : f32
    %16 = vector.broadcast %cst_7 : f32 to vector<16x1xf32>
    %17 = arith.mulf %15, %16 : vector<16x1xf32>
    %18 = math.sqrt %17 : vector<16x1xf32>
    %cst_8 = arith.constant 9.99999997E-7 : f32
    %19 = vector.broadcast %cst_8 : f32 to vector<16x1xf32>
    %20 = arith.addf %18, %19 : vector<16x1xf32>
    %21 = tpu.reciprocal %20 : vector<16x1xf32> -> vector<16x1xf32>
    %22 = vector.broadcast %21 : vector<16x1xf32> to vector<16x32xf32>
    %23 = arith.mulf %12, %22 : vector<16x32xf32>
    %c0_9 = arith.constant 0 : index
    %c0_10 = arith.constant 0 : index
    %24 = vector.load %arg2[%c0_9, %c0_10] : memref<32x192xf32, #tpu.memory_space<vmem>>, vector<32x96xf32>
    %cst_11 = arith.constant dense<0.000000e+00> : vector<16x96xf32>
    %25 = tpu.matmul %23, %24, %cst_11 {dimension_numbers = #tpu.dot_dimension_numbers<[1], [0], [0], [1], [0, 0, 1, 1], [], []>} : vector<16x32xf32>, vector<32x96xf32>, vector<16x96xf32> -> vector<16x96xf32>
    %c0_12 = arith.constant 0 : index
    %c0_13 = arith.constant 0 : index
    %26 = vector.load %arg4[%c0_12, %c0_13] : memref<1x224xf32, #tpu.memory_space<vmem>>, vector<1x96xf32>
    %27 = vector.broadcast %26 : vector<1x96xf32> to vector<16x96xf32>
    %28 = arith.addf %25, %27 : vector<16x96xf32>
    %29 = vector.extract_strided_slice %6 {offsets = [0, 0], sizes = [8, 8], strides = [1, 1]} : vector<16x8xf32> to vector<8x8xf32>
    %30 = vector.extract_strided_slice %28 {offsets = [0, 0], sizes = [8, 8], strides = [1, 1]} : vector<16x96xf32> to vector<8x8xf32>
    %31 = vector.extract_strided_slice %28 {offsets = [0, 32], sizes = [8, 8], strides = [1, 1]} : vector<16x96xf32> to vector<8x8xf32>
    %32 = vector.extract_strided_slice %28 {offsets = [0, 64], sizes = [8, 8], strides = [1, 1]} : vector<16x96xf32> to vector<8x8xf32>
    %cst_14 = arith.constant dense<0.000000e+00> : vector<8x8xf32>
    %33 = tpu.matmul %30, %31, %cst_14 {dimension_numbers = #tpu.dot_dimension_numbers<[1], [1], [0], [0], [0, 0, 1, 0], [], []>} : vector<8x8xf32>, vector<8x8xf32>, vector<8x8xf32> -> vector<8x8xf32>
    %cst_15 = arith.constant 0.353553385 : f32
    %34 = vector.broadcast %cst_15 : f32 to vector<8x8xf32>
    %35 = arith.mulf %33, %34 : vector<8x8xf32>
    %36 = arith.addf %35, %29 : vector<8x8xf32>
    %cst_16 = arith.constant dense<0xFF800000> : vector<8xf32>
    %37 = vector.multi_reduction <maximumf>, %36, %cst_16 [1] : vector<8x8xf32> to vector<8xf32>
    %38 = vector.shape_cast %37 : vector<8xf32> to vector<8x1xf32>
    %39 = vector.broadcast %38 : vector<8x1xf32> to vector<8x8xf32>
    %40 = arith.subf %36, %39 : vector<8x8xf32>
    %41 = math.exp %40 : vector<8x8xf32>
    %cst_17 = arith.constant dense<0.000000e+00> : vector<8xf32>
    %42 = vector.multi_reduction <add>, %41, %cst_17 [1] : vector<8x8xf32> to vector<8xf32>
    %43 = vector.shape_cast %42 : vector<8xf32> to vector<8x1xf32>
    %44 = tpu.reciprocal %43 : vector<8x1xf32> -> vector<8x1xf32>
    %45 = vector.broadcast %44 : vector<8x1xf32> to vector<8x8xf32>
    %46 = arith.mulf %41, %45 : vector<8x8xf32>
    %cst_18 = arith.constant dense<0.000000e+00> : vector<8x8xf32>
    %47 = tpu.matmul %46, %32, %cst_18 {dimension_numbers = #tpu.dot_dimension_numbers<[1], [0], [0], [1], [0, 0, 1, 1], [], []>} : vector<8x8xf32>, vector<8x8xf32>, vector<8x8xf32> -> vector<8x8xf32>
    %c0_19 = arith.constant 0 : index
    %c0_20 = arith.constant 0 : index
    %48 = vector.load %arg6[%c0_19, %c0_20] : memref<16x32xf32, #tpu.memory_space<vmem>>, vector<8x8xf32>
    tpu.vector_store %arg6[%c0_19, %c0_20], %47 {strides = array<i32>} : memref<16x32xf32, #tpu.memory_space<vmem>>, vector<8x8xf32>,
    %49 = vector.extract_strided_slice %28 {offsets = [0, 8], sizes = [8, 8], strides = [1, 1]} : vector<16x96xf32> to vector<8x8xf32>
    %50 = vector.extract_strided_slice %28 {offsets = [0, 40], sizes = [8, 8], strides = [1, 1]} : vector<16x96xf32> to vector<8x8xf32>
    %51 = vector.extract_strided_slice %28 {offsets = [0, 72], sizes = [8, 8], strides = [1, 1]} : vector<16x96xf32> to vector<8x8xf32>
    %cst_21 = arith.constant dense<0.000000e+00> : vector<8x8xf32>
    %52 = tpu.matmul %49, %50, %cst_21 {dimension_numbers = #tpu.dot_dimension_numbers<[1], [1], [0], [0], [0, 0, 1, 0], [], []>} : vector<8x8xf32>, vector<8x8xf32>, vector<8x8xf32> -> vector<8x8xf32>
    %cst_22 = arith.constant 0.353553385 : f32
    %53 = vector.broadcast %cst_22 : f32 to vector<8x8xf32>
    %54 = arith.mulf %52, %53 : vector<8x8xf32>
    %55 = arith.addf %54, %29 : vector<8x8xf32>
    %cst_23 = arith.constant dense<0xFF800000> : vector<8xf32>
    %56 = vector.multi_reduction <maximumf>, %55, %cst_23 [1] : vector<8x8xf32> to vector<8xf32>
    %57 = vector.shape_cast %56 : vector<8xf32> to vector<8x1xf32>
    %58 = vector.broadcast %57 : vector<8x1xf32> to vector<8x8xf32>
    %59 = arith.subf %55, %58 : vector<8x8xf32>
    %60 = math.exp %59 : vector<8x8xf32>
    %cst_24 = arith.constant dense<0.000000e+00> : vector<8xf32>
    %61 = vector.multi_reduction <add>, %60, %cst_24 [1] : vector<8x8xf32> to vector<8xf32>
    %62 = vector.shape_cast %61 : vector<8xf32> to vector<8x1xf32>
    %63 = tpu.reciprocal %62 : vector<8x1xf32> -> vector<8x1xf32>
    %64 = vector.broadcast %63 : vector<8x1xf32> to vector<8x8xf32>
    %65 = arith.mulf %60, %64 : vector<8x8xf32>
    %cst_25 = arith.constant dense<0.000000e+00> : vector<8x8xf32>
    %66 = tpu.matmul %65, %51, %cst_25 {dimension_numbers = #tpu.dot_dimension_numbers<[1], [0], [0], [1], [0, 0, 1, 1], [], []>} : vector<8x8xf32>, vector<8x8xf32>, vector<8x8xf32> -> vector<8x8xf32>
    %c0_26 = arith.constant 0 : index
    %c8 = arith.constant 8 : index
    %67 = vector.load %arg6[%c0_26, %c8] : memref<16x32xf32, #tpu.memory_space<vmem>>, vector<8x8xf32>
    tpu.vector_store %arg6[%c0_26, %c8], %66 {strides = array<i32>} : memref<16x32xf32, #tpu.memory_space<vmem>>, vector<8x8xf32>,
    %68 = vector.extract_strided_slice %28 {offsets = [0, 16], sizes = [8, 8], strides = [1, 1]} : vector<16x96xf32> to vector<8x8xf32>
    %69 = vector.extract_strided_slice %28 {offsets = [0, 48], sizes = [8, 8], strides = [1, 1]} : vector<16x96xf32> to vector<8x8xf32>
    %70 = vector.extract_strided_slice %28 {offsets = [0, 80], sizes = [8, 8], strides = [1, 1]} : vector<16x96xf32> to vector<8x8xf32>
    %cst_27 = arith.constant dense<0.000000e+00> : vector<8x8xf32>
    %71 = tpu.matmul %68, %69, %cst_27 {dimension_numbers = #tpu.dot_dimension_numbers<[1], [1], [0], [0], [0, 0, 1, 0], [], []>} : vector<8x8xf32>, vector<8x8xf32>, vector<8x8xf32> -> vector<8x8xf32>
    %cst_28 = arith.constant 0.353553385 : f32
    %72 = vector.broadcast %cst_28 : f32 to vector<8x8xf32>
    %73 = arith.mulf %71, %72 : vector<8x8xf32>
    %74 = arith.addf %73, %29 : vector<8x8xf32>
    %cst_29 = arith.constant dense<0xFF800000> : vector<8xf32>
    %75 = vector.multi_reduction <maximumf>, %74, %cst_29 [1] : vector<8x8xf32> to vector<8xf32>
    %76 = vector.shape_cast %75 : vector<8xf32> to vector<8x1xf32>
    %77 = vector.broadcast %76 : vector<8x1xf32> to vector<8x8xf32>
    %78 = arith.subf %74, %77 : vector<8x8xf32>
    %79 = math.exp %78 : vector<8x8xf32>
    %cst_30 = arith.constant dense<0.000000e+00> : vector<8xf32>
    %80 = vector.multi_reduction <add>, %79, %cst_30 [1] : vector<8x8xf32> to vector<8xf32>
    %81 = vector.shape_cast %80 : vector<8xf32> to vector<8x1xf32>
    %82 = tpu.reciprocal %81 : vector<8x1xf32> -> vector<8x1xf32>
    %83 = vector.broadcast %82 : vector<8x1xf32> to vector<8x8xf32>
    %84 = arith.mulf %79, %83 : vector<8x8xf32>
    %cst_31 = arith.constant dense<0.000000e+00> : vector<8x8xf32>
    %85 = tpu.matmul %84, %70, %cst_31 {dimension_numbers = #tpu.dot_dimension_numbers<[1], [0], [0], [1], [0, 0, 1, 1], [], []>} : vector<8x8xf32>, vector<8x8xf32>, vector<8x8xf32> -> vector<8x8xf32>
    %c0_32 = arith.constant 0 : index
    %c16 = arith.constant 16 : index
    %86 = vector.load %arg6[%c0_32, %c16] : memref<16x32xf32, #tpu.memory_space<vmem>>, vector<8x8xf32>
    tpu.vector_store %arg6[%c0_32, %c16], %85 {strides = array<i32>} : memref<16x32xf32, #tpu.memory_space<vmem>>, vector<8x8xf32>,
    %87 = vector.extract_strided_slice %28 {offsets = [0, 24], sizes = [8, 8], strides = [1, 1]} : vector<16x96xf32> to vector<8x8xf32>
    %88 = vector.extract_strided_slice %28 {offsets = [0, 56], sizes = [8, 8], strides = [1, 1]} : vector<16x96xf32> to vector<8x8xf32>
    %89 = vector.extract_strided_slice %28 {offsets = [0, 88], sizes = [8, 8], strides = [1, 1]} : vector<16x96xf32> to vector<8x8xf32>
    %cst_33 = arith.constant dense<0.000000e+00> : vector<8x8xf32>
    %90 = tpu.matmul %87, %88, %cst_33 {dimension_numbers = #tpu.dot_dimension_numbers<[1], [1], [0], [0], [0, 0, 1, 0], [], []>} : vector<8x8xf32>, vector<8x8xf32>, vector<8x8xf32> -> vector<8x8xf32>
    %cst_34 = arith.constant 0.353553385 : f32
    %91 = vector.broadcast %cst_34 : f32 to vector<8x8xf32>
    %92 = arith.mulf %90, %91 : vector<8x8xf32>
    %93 = arith.addf %92, %29 : vector<8x8xf32>
    %cst_35 = arith.constant dense<0xFF800000> : vector<8xf32>
    %94 = vector.multi_reduction <maximumf>, %93, %cst_35 [1] : vector<8x8xf32> to vector<8xf32>
    %95 = vector.shape_cast %94 : vector<8xf32> to vector<8x1xf32>
    %96 = vector.broadcast %95 : vector<8x1xf32> to vector<8x8xf32>
    %97 = arith.subf %93, %96 : vector<8x8xf32>
    %98 = math.exp %97 : vector<8x8xf32>
    %cst_36 = arith.constant dense<0.000000e+00> : vector<8xf32>
    %99 = vector.multi_reduction <add>, %98, %cst_36 [1] : vector<8x8xf32> to vector<8xf32>
    %100 = vector.shape_cast %99 : vector<8xf32> to vector<8x1xf32>
    %101 = tpu.reciprocal %100 : vector<8x1xf32> -> vector<8x1xf32>
    %102 = vector.broadcast %101 : vector<8x1xf32> to vector<8x8xf32>
    %103 = arith.mulf %98, %102 : vector<8x8xf32>
    %cst_37 = arith.constant dense<0.000000e+00> : vector<8x8xf32>
    %104 = tpu.matmul %103, %89, %cst_37 {dimension_numbers = #tpu.dot_dimension_numbers<[1], [0], [0], [1], [0, 0, 1, 1], [], []>} : vector<8x8xf32>, vector<8x8xf32>, vector<8x8xf32> -> vector<8x8xf32>
    %c0_38 = arith.constant 0 : index
    %c24 = arith.constant 24 : index
    %105 = vector.load %arg6[%c0_38, %c24] : memref<16x32xf32, #tpu.memory_space<vmem>>, vector<8x8xf32>
    tpu.vector_store %arg6[%c0_38, %c24], %104 {strides = array<i32>} : memref<16x32xf32, #tpu.memory_space<vmem>>, vector<8x8xf32>,
    %106 = vector.extract_strided_slice %6 {offsets = [8, 0], sizes = [8, 8], strides = [1, 1]} : vector<16x8xf32> to vector<8x8xf32>
    %107 = vector.extract_strided_slice %28 {offsets = [8, 0], sizes = [8, 8], strides = [1, 1]} : vector<16x96xf32> to vector<8x8xf32>
    %108 = vector.extract_strided_slice %28 {offsets = [8, 32], sizes = [8, 8], strides = [1, 1]} : vector<16x96xf32> to vector<8x8xf32>
    %109 = vector.extract_strided_slice %28 {offsets = [8, 64], sizes = [8, 8], strides = [1, 1]} : vector<16x96xf32> to vector<8x8xf32>
    %cst_39 = arith.constant dense<0.000000e+00> : vector<8x8xf32>
    %110 = tpu.matmul %107, %108, %cst_39 {dimension_numbers = #tpu.dot_dimension_numbers<[1], [1], [0], [0], [0, 0, 1, 0], [], []>} : vector<8x8xf32>, vector<8x8xf32>, vector<8x8xf32> -> vector<8x8xf32>
    %cst_40 = arith.constant 0.353553385 : f32
    %111 = vector.broadcast %cst_40 : f32 to vector<8x8xf32>
    %112 = arith.mulf %110, %111 : vector<8x8xf32>
    %113 = arith.addf %112, %106 : vector<8x8xf32>
    %cst_41 = arith.constant dense<0xFF800000> : vector<8xf32>
    %114 = vector.multi_reduction <maximumf>, %113, %cst_41 [1] : vector<8x8xf32> to vector<8xf32>
    %115 = vector.shape_cast %114 : vector<8xf32> to vector<8x1xf32>
    %116 = vector.broadcast %115 : vector<8x1xf32> to vector<8x8xf32>
    %117 = arith.subf %113, %116 : vector<8x8xf32>
    %118 = math.exp %117 : vector<8x8xf32>
    %cst_42 = arith.constant dense<0.000000e+00> : vector<8xf32>
    %119 = vector.multi_reduction <add>, %118, %cst_42 [1] : vector<8x8xf32> to vector<8xf32>
    %120 = vector.shape_cast %119 : vector<8xf32> to vector<8x1xf32>
    %121 = tpu.reciprocal %120 : vector<8x1xf32> -> vector<8x1xf32>
    %122 = vector.broadcast %121 : vector<8x1xf32> to vector<8x8xf32>
    %123 = arith.mulf %118, %122 : vector<8x8xf32>
    %cst_43 = arith.constant dense<0.000000e+00> : vector<8x8xf32>
    %124 = tpu.matmul %123, %109, %cst_43 {dimension_numbers = #tpu.dot_dimension_numbers<[1], [0], [0], [1], [0, 0, 1, 1], [], []>} : vector<8x8xf32>, vector<8x8xf32>, vector<8x8xf32> -> vector<8x8xf32>
    %c8_44 = arith.constant 8 : index
    %c0_45 = arith.constant 0 : index
    %125 = vector.load %arg6[%c8_44, %c0_45] : memref<16x32xf32, #tpu.memory_space<vmem>>, vector<8x8xf32>
    tpu.vector_store %arg6[%c8_44, %c0_45], %124 {strides = array<i32>} : memref<16x32xf32, #tpu.memory_space<vmem>>, vector<8x8xf32>,
    %126 = vector.extract_strided_slice %28 {offsets = [8, 8], sizes = [8, 8], strides = [1, 1]} : vector<16x96xf32> to vector<8x8xf32>
    %127 = vector.extract_strided_slice %28 {offsets = [8, 40], sizes = [8, 8], strides = [1, 1]} : vector<16x96xf32> to vector<8x8xf32>
    %128 = vector.extract_strided_slice %28 {offsets = [8, 72], sizes = [8, 8], strides = [1, 1]} : vector<16x96xf32> to vector<8x8xf32>
    %cst_46 = arith.constant dense<0.000000e+00> : vector<8x8xf32>
    %129 = tpu.matmul %126, %127, %cst_46 {dimension_numbers = #tpu.dot_dimension_numbers<[1], [1], [0], [0], [0, 0, 1, 0], [], []>} : vector<8x8xf32>, vector<8x8xf32>, vector<8x8xf32> -> vector<8x8xf32>
    %cst_47 = arith.constant 0.353553385 : f32
    %130 = vector.broadcast %cst_47 : f32 to vector<8x8xf32>
    %131 = arith.mulf %129, %130 : vector<8x8xf32>
    %132 = arith.addf %131, %106 : vector<8x8xf32>
    %cst_48 = arith.constant dense<0xFF800000> : vector<8xf32>
    %133 = vector.multi_reduction <maximumf>, %132, %cst_48 [1] : vector<8x8xf32> to vector<8xf32>
    %134 = vector.shape_cast %133 : vector<8xf32> to vector<8x1xf32>
    %135 = vector.broadcast %134 : vector<8x1xf32> to vector<8x8xf32>
    %136 = arith.subf %132, %135 : vector<8x8xf32>
    %137 = math.exp %136 : vector<8x8xf32>
    %cst_49 = arith.constant dense<0.000000e+00> : vector<8xf32>
    %138 = vector.multi_reduction <add>, %137, %cst_49 [1] : vector<8x8xf32> to vector<8xf32>
    %139 = vector.shape_cast %138 : vector<8xf32> to vector<8x1xf32>
    %140 = tpu.reciprocal %139 : vector<8x1xf32> -> vector<8x1xf32>
    %141 = vector.broadcast %140 : vector<8x1xf32> to vector<8x8xf32>
    %142 = arith.mulf %137, %141 : vector<8x8xf32>
    %cst_50 = arith.constant dense<0.000000e+00> : vector<8x8xf32>
    %143 = tpu.matmul %142, %128, %cst_50 {dimension_numbers = #tpu.dot_dimension_numbers<[1], [0], [0], [1], [0, 0, 1, 1], [], []>} : vector<8x8xf32>, vector<8x8xf32>, vector<8x8xf32> -> vector<8x8xf32>
    %c8_51 = arith.constant 8 : index
    %c8_52 = arith.constant 8 : index
    %144 = vector.load %arg6[%c8_51, %c8_52] : memref<16x32xf32, #tpu.memory_space<vmem>>, vector<8x8xf32>
    tpu.vector_store %arg6[%c8_51, %c8_52], %143 {strides = array<i32>} : memref<16x32xf32, #tpu.memory_space<vmem>>, vector<8x8xf32>,
    %145 = vector.extract_strided_slice %28 {offsets = [8, 16], sizes = [8, 8], strides = [1, 1]} : vector<16x96xf32> to vector<8x8xf32>
    %146 = vector.extract_strided_slice %28 {offsets = [8, 48], sizes = [8, 8], strides = [1, 1]} : vector<16x96xf32> to vector<8x8xf32>
    %147 = vector.extract_strided_slice %28 {offsets = [8, 80], sizes = [8, 8], strides = [1, 1]} : vector<16x96xf32> to vector<8x8xf32>
    %cst_53 = arith.constant dense<0.000000e+00> : vector<8x8xf32>
    %148 = tpu.matmul %145, %146, %cst_53 {dimension_numbers = #tpu.dot_dimension_numbers<[1], [1], [0], [0], [0, 0, 1, 0], [], []>} : vector<8x8xf32>, vector<8x8xf32>, vector<8x8xf32> -> vector<8x8xf32>
    %cst_54 = arith.constant 0.353553385 : f32
    %149 = vector.broadcast %cst_54 : f32 to vector<8x8xf32>
    %150 = arith.mulf %148, %149 : vector<8x8xf32>
    %151 = arith.addf %150, %106 : vector<8x8xf32>
    %cst_55 = arith.constant dense<0xFF800000> : vector<8xf32>
    %152 = vector.multi_reduction <maximumf>, %151, %cst_55 [1] : vector<8x8xf32> to vector<8xf32>
    %153 = vector.shape_cast %152 : vector<8xf32> to vector<8x1xf32>
    %154 = vector.broadcast %153 : vector<8x1xf32> to vector<8x8xf32>
    %155 = arith.subf %151, %154 : vector<8x8xf32>
    %156 = math.exp %155 : vector<8x8xf32>
    %cst_56 = arith.constant dense<0.000000e+00> : vector<8xf32>
    %157 = vector.multi_reduction <add>, %156, %cst_56 [1] : vector<8x8xf32> to vector<8xf32>
    %158 = vector.shape_cast %157 : vector<8xf32> to vector<8x1xf32>
    %159 = tpu.reciprocal %158 : vector<8x1xf32> -> vector<8x1xf32>
    %160 = vector.broadcast %159 : vector<8x1xf32> to vector<8x8xf32>
    %161 = arith.mulf %156, %160 : vector<8x8xf32>
    %cst_57 = arith.constant dense<0.000000e+00> : vector<8x8xf32>
    %162 = tpu.matmul %161, %147, %cst_57 {dimension_numbers = #tpu.dot_dimension_numbers<[1], [0], [0], [1], [0, 0, 1, 1], [], []>} : vector<8x8xf32>, vector<8x8xf32>, vector<8x8xf32> -> vector<8x8xf32>
    %c8_58 = arith.constant 8 : index
    %c16_59 = arith.constant 16 : index
    %163 = vector.load %arg6[%c8_58, %c16_59] : memref<16x32xf32, #tpu.memory_space<vmem>>, vector<8x8xf32>
    tpu.vector_store %arg6[%c8_58, %c16_59], %162 {strides = array<i32>} : memref<16x32xf32, #tpu.memory_space<vmem>>, vector<8x8xf32>,
    %164 = vector.extract_strided_slice %28 {offsets = [8, 24], sizes = [8, 8], strides = [1, 1]} : vector<16x96xf32> to vector<8x8xf32>
    %165 = vector.extract_strided_slice %28 {offsets = [8, 56], sizes = [8, 8], strides = [1, 1]} : vector<16x96xf32> to vector<8x8xf32>
    %166 = vector.extract_strided_slice %28 {offsets = [8, 88], sizes = [8, 8], strides = [1, 1]} : vector<16x96xf32> to vector<8x8xf32>
    %cst_60 = arith.constant dense<0.000000e+00> : vector<8x8xf32>
    %167 = tpu.matmul %164, %165, %cst_60 {dimension_numbers = #tpu.dot_dimension_numbers<[1], [1], [0], [0], [0, 0, 1, 0], [], []>} : vector<8x8xf32>, vector<8x8xf32>, vector<8x8xf32> -> vector<8x8xf32>
    %cst_61 = arith.constant 0.353553385 : f32
    %168 = vector.broadcast %cst_61 : f32 to vector<8x8xf32>
    %169 = arith.mulf %167, %168 : vector<8x8xf32>
    %170 = arith.addf %169, %106 : vector<8x8xf32>
    %cst_62 = arith.constant dense<0xFF800000> : vector<8xf32>
    %171 = vector.multi_reduction <maximumf>, %170, %cst_62 [1] : vector<8x8xf32> to vector<8xf32>
    %172 = vector.shape_cast %171 : vector<8xf32> to vector<8x1xf32>
    %173 = vector.broadcast %172 : vector<8x1xf32> to vector<8x8xf32>
    %174 = arith.subf %170, %173 : vector<8x8xf32>
    %175 = math.exp %174 : vector<8x8xf32>
    %cst_63 = arith.constant dense<0.000000e+00> : vector<8xf32>
    %176 = vector.multi_reduction <add>, %175, %cst_63 [1] : vector<8x8xf32> to vector<8xf32>
    %177 = vector.shape_cast %176 : vector<8xf32> to vector<8x1xf32>
    %178 = tpu.reciprocal %177 : vector<8x1xf32> -> vector<8x1xf32>
    %179 = vector.broadcast %178 : vector<8x1xf32> to vector<8x8xf32>
    %180 = arith.mulf %175, %179 : vector<8x8xf32>
    %cst_64 = arith.constant dense<0.000000e+00> : vector<8x8xf32>
    %181 = tpu.matmul %180, %166, %cst_64 {dimension_numbers = #tpu.dot_dimension_numbers<[1], [0], [0], [1], [0, 0, 1, 1], [], []>} : vector<8x8xf32>, vector<8x8xf32>, vector<8x8xf32> -> vector<8x8xf32>
    %c8_65 = arith.constant 8 : index
    %c24_66 = arith.constant 24 : index
    %182 = vector.load %arg6[%c8_65, %c24_66] : memref<16x32xf32, #tpu.memory_space<vmem>>, vector<8x8xf32>
    tpu.vector_store %arg6[%c8_65, %c24_66], %181 {strides = array<i32>} : memref<16x32xf32, #tpu.memory_space<vmem>>, vector<8x8xf32>,
    %c0_67 = arith.constant 0 : index
    %c0_68 = arith.constant 0 : index
    %183 = vector.load %arg6[%c0_67, %c0_68] : memref<16x32xf32, #tpu.memory_space<vmem>>, vector<16x32xf32>
    %c0_69 = arith.constant 0 : index
    %c96 = arith.constant 96 : index
    %184 = vector.load %arg2[%c0_69, %c96] : memref<32x192xf32, #tpu.memory_space<vmem>>, vector<32x32xf32>
    %cst_70 = arith.constant dense<0.000000e+00> : vector<16x32xf32>
    %185 = tpu.matmul %183, %184, %cst_70 {dimension_numbers = #tpu.dot_dimension_numbers<[1], [0], [0], [1], [0, 0, 1, 1], [], []>} : vector<16x32xf32>, vector<32x32xf32>, vector<16x32xf32> -> vector<16x32xf32>
    %c0_71 = arith.constant 0 : index
    %c96_72 = arith.constant 96 : index
    %186 = vector.load %arg4[%c0_71, %c96_72] : memref<1x224xf32, #tpu.memory_space<vmem>>, vector<1x32xf32>
    %187 = vector.broadcast %186 : vector<1x32xf32> to vector<16x32xf32>
    %188 = arith.addf %185, %187 : vector<16x32xf32>
    %189 = arith.addf %0, %188 : vector<16x32xf32>
    %cst_73 = arith.constant dense<0.000000e+00> : vector<16xf32>
    %190 = vector.multi_reduction <add>, %189, %cst_73 [1] : vector<16x32xf32> to vector<16xf32>
    %191 = vector.shape_cast %190 : vector<16xf32> to vector<16x1xf32>
    %cst_74 = arith.constant 3.200000e+01 : f32
    %192 = vector.broadcast %cst_74 : f32 to vector<16x1xf32>
    %193 = arith.divf %191, %192 : vector<16x1xf32>
    %194 = vector.broadcast %193 : vector<16x1xf32> to vector<16x32xf32>
    %195 = arith.subf %189, %194 : vector<16x32xf32>
    %196 = arith.mulf %195, %195 : vector<16x32xf32>
    %cst_75 = arith.constant dense<0.000000e+00> : vector<16xf32>
    %197 = vector.multi_reduction <add>, %196, %cst_75 [1] : vector<16x32xf32> to vector<16xf32>
    %198 = vector.shape_cast %197 : vector<16xf32> to vector<16x1xf32>
    %cst_76 = arith.constant 0.0322580636 : f32
    %199 = vector.broadcast %cst_76 : f32 to vector<16x1xf32>
    %200 = arith.mulf %198, %199 : vector<16x1xf32>
    %201 = math.sqrt %200 : vector<16x1xf32>
    %cst_77 = arith.constant 9.99999997E-7 : f32
    %202 = vector.broadcast %cst_77 : f32 to vector<16x1xf32>
    %203 = arith.addf %201, %202 : vector<16x1xf32>
    %204 = tpu.reciprocal %203 : vector<16x1xf32> -> vector<16x1xf32>
    %205 = vector.broadcast %204 : vector<16x1xf32> to vector<16x32xf32>
    %206 = arith.mulf %195, %205 : vector<16x32xf32>
    %c0_78 = arith.constant 0 : index
    %c128 = arith.constant 128 : index
    %207 = vector.load %arg2[%c0_78, %c128] : memref<32x192xf32, #tpu.memory_space<vmem>>, vector<32x64xf32>
    %cst_79 = arith.constant dense<0.000000e+00> : vector<16x64xf32>
    %208 = tpu.matmul %206, %207, %cst_79 {dimension_numbers = #tpu.dot_dimension_numbers<[1], [0], [0], [1], [0, 0, 1, 1], [], []>} : vector<16x32xf32>, vector<32x64xf32>, vector<16x64xf32> -> vector<16x64xf32>
    %c0_80 = arith.constant 0 : index
    %c128_81 = arith.constant 128 : index
    %209 = vector.load %arg4[%c0_80, %c128_81] : memref<1x224xf32, #tpu.memory_space<vmem>>, vector<1x64xf32>
    %210 = vector.broadcast %209 : vector<1x64xf32> to vector<16x64xf32>
    %211 = arith.addf %208, %210 : vector<16x64xf32>
    %cst_82 = arith.constant 0.000000e+00 : f32
    %212 = vector.broadcast %cst_82 : f32 to vector<16x64xf32>
    %213 = arith.maximumf %211, %212 : vector<16x64xf32>
    %c0_83 = arith.constant 0 : index
    %c0_84 = arith.constant 0 : index
    %214 = vector.load %arg3[%c0_83, %c0_84] : memref<64x32xf32, #tpu.memory_space<vmem>>, vector<64x32xf32>
    %cst_85 = arith.constant dense<0.000000e+00> : vector<16x32xf32>
    %215 = tpu.matmul %213, %214, %cst_85 {dimension_numbers = #tpu.dot_dimension_numbers<[1], [0], [0], [1], [0, 0, 1, 1], [], []>} : vector<16x64xf32>, vector<64x32xf32>, vector<16x32xf32> -> vector<16x32xf32>
    %c0_86 = arith.constant 0 : index
    %c192 = arith.constant 192 : index
    %216 = vector.load %arg4[%c0_86, %c192] : memref<1x224xf32, #tpu.memory_space<vmem>>, vector<1x32xf32>
    %217 = vector.broadcast %216 : vector<1x32xf32> to vector<16x32xf32>
    %218 = arith.addf %215, %217 : vector<16x32xf32>
    %219 = arith.addf %189, %218 : vector<16x32xf32>
    %c0_87 = arith.constant 0 : index
    %c0_88 = arith.constant 0 : index
    %220 = vector.load %arg5[%c0_87, %c0_88] : memref<16x32xf32, #tpu.memory_space<vmem>>, vector<16x32xf32>
    tpu.vector_store %arg5[%c0_87, %c0_88], %219 {strides = array<i32>} : memref<16x32xf32, #tpu.memory_space<vmem>>, vector<16x32xf32>,
    return
  }
}

</mosaic_0001>

<bundles_post_ra>
// kernel: tpu_custom_call.1
= control target key start
LH: loop header
LB: loop body
LE: loop exit
PB: predicated region body
PF: predicated region fallthrough
CT: control target
= control target key end

     0   :  { %vm29_vm0 = vcmask 261120   ;;  %s2547_s0 = inlined_call_operand.vmem [shape: f32[16,32], index: 0, kind: input, shape index: {}]   ;;  %s2548_s1 = inlined_call_operand.vmem [shape: s32[16,8], index: 1, kind: input, shape index: {}]   ;;  %s2549_s2 = inlined_call_operand.vmem [shape: f32[32,192], index: 2, kind: input, shape index: {}]   ;;  %s2550_s3 = inlined_call_operand.vmem [shape: f32[64,32], index: 3, kind: input, shape index: {}]   ;;  %s2551_s4 = inlined_call_operand.vmem [shape: f32[1,224], index: 4, kind: input, shape index: {}]   ;;  %s2552_s5 = inlined_call_operand.hbm [shape: f32[16,32], index: 5, kind: output, shape index: {}]  }
   0x1   :  { %v2262_v0 = vld [vmem:[%s2547_s0] sm:$0xff]  ;;  %v2267_v1 = vld [vmem:[%s2547_s0 + $0x8] sm:$0xff] }
   0x2   :  { %10 = vsyncpa [#allocation4], 0  ;;  %v30_v2 = vsel %vm29_vm0, %v2262_v0, 0.0  ;;  %v33_v3 = vsel %vm29_vm0, %v2267_v1, 0.0  ;;  %v2280_v14 = vld [vmem:[%s2549_s2 + $0x30] sm:$0xff]  ;;  %v2285_v15 = vld [vmem:[%s2549_s2 + $0x20] sm:$0xff] }
   0x3   :  { %31 = vadd.xlane.f32.xlu0 %v30_v2  ;;  %1989 = vmatprep.subr.mxu1 %v2280_v14  ;;  %v2292_v16 = vld [vmem:[%s2549_s2 + $0x10] sm:$0xff]  ;;  %v2301_v17 = vld [vmem:[%s2549_s2] sm:$0xff]  ;;  %v2210_v38 = vmov 0.0   ;;  %vm2211_vm5 = vmmov 0   ;;  %s2212_s6 = smov 88   ;;  %s2213_s7 = smov 96  }
   0x4   :  { %1990 = vmatpush3.msra.mxu1 %v2280_v14  ;;  %2010 = vmatprep.subr.mxu0 %v2210_v38  ;;  %v2316_v40 = vld [vmem:[%s2551_s4] ss:$0 sm:$0xff]  ;;  %s2214_s8 = smov 120   ;;  %s2215_s9 = smov 112   ;;  %vm166_vm6 = vcmask 64512   ;;  %vm502_vm9 = vcmask 130112  }
   0x5   :  { %1991 = vmatprep.subr.mxu1 %v2285_v15  ;;  %2012 = vmatprep.mubr.msk.f32.mxu0 %vm2211_vm5, %v2210_v38  ;;  %s2216_s10 = smov 80   ;;  %s2217_s11 = smov 104   ;;  %v23_v58 = vld [vmem:[%s2548_s1] sm:$0xff]  ;;  %vm675_vm10 = vcmask 195712   ;;  %vm848_vm11 = vcmask 261312  }
   0x6   :  { %1992 = vmatpush3.msra.mxu1 %v2285_v15  ;;  %s2218_s12 = smov 72   ;;  %vm25_vm7 = vcmp.eq.s32.totalorder %v23_v58, 0  ;;  %s2220_s17 = smov 48  }
   0x7   :  { %34 = vadd.xlane.f32.xlu0 %v33_v3  ;;  %1993 = vmatprep.subr.mxu1 %v2292_v16  ;;  %v27_v60 = vsel %vm25_vm7, -1e+09, %v2210_v38  ;;  %s2221_s18 = smov 40   ;;  %s2222_s19 = smov 56  }
   0x8   :  { %1994 = vmatpush3.msra.mxu1 %v2292_v16  ;;  %s2223_s20 = smov 8   ;;  %s2224_s21 = smov 16  }
   0x9   :  { %1995 = vmatprep.subr.mxu1 %v2301_v17  ;;  %s2225_s0 = smov 24   ;;  %s2226_s22 = smov 32  }
   0xa   :  { %1996 = vmatpush3.msra.mxu1 %v2301_v17 }
   0xb   :  { %2000 = vmatprep.subr.mxu1 %v2210_v38 }
  0x8c   :  { %v32_v4 = vpop.xlane.xlu0 %31 }
  0x8d   :  { %v37_v5 = vmul.f32 0.03125, %v32_v4 }
  0x8f   :  { %v39_v6 = vsub.f32 %v2262_v0, %v37_v5 }
  0x90   :  { %v35_v7 = vpop.xlane.xlu0 %34 }
  0x91   :  { %v38_v8 = vmul.f32 0.03125, %v35_v7  ;;  %v41_v9 = vmul.f32 %v39_v6, %v39_v6 }
  0x93   :  { %v40_v10 = vsub.f32 %v2267_v1, %v38_v8  ;;  %v43_v11 = vsel %vm29_vm0, %v41_v9, 0.0 }
  0x94   :  { %44 = vadd.xlane.f32.xlu1 %v43_v11  ;;  %v24_v11 = vld [vmem:[%s2548_s1 + $0x8] sm:$0xff]  ;;  %s2219_s1 = smov 64  }
  0x95   :  { %v42_v12 = vmul.f32 %v40_v10, %v40_v10  ;;  %vm26_vm8 = vcmp.eq.s32.totalorder %v24_v11, 0 }
  0x97   :  { %v46_v13 = vsel %vm29_vm0, %v42_v12, 0.0 }
  0x98   :  { %47 = vadd.xlane.f32.xlu1 %v46_v13 }
 0x11d   :  { %v45_v18 = vpop.xlane.xlu1 %44 }
 0x11e   :  { %v49_v19 = vmul.f32 0.032258064, %v45_v18 }
 0x120   :  { %2140 = vrsqrt.f32 %v49_v19  ;;  %vm53_vm1 = vcmp.eq.f32.partialorder %v49_v19, inf  ;;  %v56_v24 = vand.u32 2147483648, %v49_v19  ;;  %vm55_vm2 = vcmp.eq.f32.partialorder %v49_v19, 0.0 }
 0x121   :  { %v48_v20 = vpop.xlane.xlu1 %47 }
 0x122   :  { %v50_v21 = vmul.f32 0.032258064, %v48_v20 }
 0x124   :  { %2142 = vrsqrt.f32 %v50_v21  ;;  %vm60_vm3 = vcmp.eq.f32.partialorder %v50_v21, inf  ;;  %v63_v30 = vand.u32 2147483648, %v50_v21  ;;  %vm62_vm4 = vcmp.eq.f32.partialorder %v50_v21, 0.0 }
 0x12d   :  { %v2141_v22 = vpop.eup %2140 }
 0x12e   :  { %v52_v23 = vmul.f32 %v2141_v22, %v49_v19 }
 0x130   :  { %v54_v25 = vsel %vm53_vm1, %v49_v19, %v52_v23  ;;  %v28_v23 = vsel %vm26_vm8, -1e+09, %v2210_v38  ;;  %vm1792_vm1 = vcmask 523264  }
 0x131   :  { %v2143_v26 = vpop.eup %2142  ;;  %v57_v27 = vsel %vm55_vm2, %v56_v24, %v54_v25 }
 0x132   :  { %v59_v28 = vmul.f32 %v2143_v26, %v50_v21  ;;  %v65_v29 = vadd.f32 1e-06, %v57_v27 }
 0x134   :  { %v61_v31 = vsel %vm60_vm3, %v50_v21, %v59_v28  ;;  %2144 = vrcp.f32 %v65_v29 }
 0x135   :  { %v64_v32 = vsel %vm62_vm4, %v63_v30, %v61_v31 }
 0x136   :  { %v66_v33 = vadd.f32 1e-06, %v64_v32 }
 0x138   :  { %2146 = vrcp.f32 %v66_v33 }
 0x141   :  { %v2145_v34 = vpop.eup %2144 }
 0x142   :  { %v69_v35 = vmul.f32 %v2145_v34, %v39_v6 }
 0x144   :  { %1997 = vmatprep.mubr.msk.f32.mxu1 %vm29_vm0, %v69_v35 }
 0x145   :  { %v2147_v36 = vpop.eup %2146 }
 0x146   :  { %v70_v37 = vmul.f32 %v2147_v36, %v40_v10 }
 0x148   :  { %1998 = vmatmul.mubr.msk.f32.vlgmr.msra.gmra.mxu1 %vm29_vm0, %v70_v37 }
 0x149   :  { %2002 = vmatprep.mubr.msk.f32.mxu1 %vm2211_vm5, %v2210_v38 }
 0x208   :  { %v1999_v39 = vpop.f32.mrf.mxu1 }
 0x209   :  { %v2328_v43 = vadd.f32 %v1999_v39, %v2316_v40 }
 0x20a   :  { %v154_v41 = vpop.f32.mrf.mxu1 }
 0x20b   :  { %v2319_v42 = vadd.f32 %v2316_v40, %v154_v41 }
 0x20d   :  { %333 = vrot.lane.b32.xlu1 %v2319_v42, %s2212_s6  ;;  %164 = vrot.lane.b32.xlu0 %v2319_v42, %s2213_s7 }
 0x211   :  { %331 = vrot.lane.b32.xlu1 %v2319_v42, %s2214_s8  ;;  %504 = vrot.lane.b32.xlu0 %v2319_v42, %s2215_s9 }
 0x215   :  { %506 = vrot.lane.b32.xlu1 %v2319_v42, %s2216_s10  ;;  %677 = vrot.lane.b32.xlu0 %v2319_v42, %s2217_s11 }
 0x219   :  { %679 = vrot.lane.b32.xlu1 %v2319_v42, %s2218_s12  ;;  %1019 = vrot.lane.b32.xlu0 %v2328_v43, %s2212_s6 }
 0x21d   :  { %851 = vrot.lane.b32.xlu1 %v2328_v43, %s2213_s7  ;;  %1191 = vrot.lane.b32.xlu0 %v2328_v43, %s2216_s10 }
 0x221   :  { %1017 = vrot.lane.b32.xlu1 %v2328_v43, %s2214_s8  ;;  %1363 = vrot.lane.b32.xlu0 %v2328_v43, %s2218_s12 }
 0x225   :  { %1189 = vrot.lane.b32.xlu1 %v2328_v43, %s2215_s9 }
 0x229   :  { %1361 = vrot.lane.b32.xlu1 %v2328_v43, %s2217_s11 }
 0x27f   :  { %v334_v44 = vpop.permute.xlu1 %333  ;;  %v165_v45 = vpop.permute.xlu0 %164 }
 0x280   :  { %2001 = vmatpush3.xpose.msk.msra.mxu1 %vm166_vm6, %v165_v45  ;;  %2011 = vmatpush3.xpose.msk.msra.mxu0 %vm166_vm6, %v334_v44 }
 0x281   :  { %2020 = vmatprep.subr.mxu0 %v2210_v38  ;;  %2005 = vmatprep.subr.mxu1 %v2210_v38 }
 0x283   :  { %v332_v46 = vpop.permute.xlu1 %331  ;;  %2003 = vmatmul.mubr.msk.f32.vlgmr.msra.gmra.mxu1 %vm166_vm6, %v2319_v42  ;;  %v505_v47 = vpop.permute.xlu0 %504 }
 0x284   :  { %2013 = vmatmul.mubr.msk.f32.vlgmr.msra.gmra.mxu0 %vm166_vm6, %v332_v46  ;;  %2007 = vmatprep.mubr.msk.f32.mxu1 %vm2211_vm5, %v2210_v38 }
 0x285   :  { %2022 = vmatprep.mubr.msk.f32.mxu0 %vm2211_vm5, %v2210_v38 }
 0x287   :  { %v507_v48 = vpop.permute.xlu1 %506  ;;  %v678_v49 = vpop.permute.xlu0 %677 }
 0x288   :  { %2021 = vmatpush3.xpose.msk.msra.mxu0 %vm166_vm6, %v507_v48 }
 0x289   :  { %2030 = vmatprep.subr.mxu0 %v2210_v38 }
 0x28b   :  { %v680_v50 = vpop.permute.xlu1 %679  ;;  %2023 = vmatmul.mubr.msk.f32.vlgmr.msra.gmra.mxu0 %vm166_vm6, %v505_v47  ;;  %v1020_v51 = vpop.permute.xlu0 %1019 }
 0x28c   :  { %2031 = vmatpush3.xpose.msk.msra.mxu0 %vm166_vm6, %v680_v50  ;;  %2032 = vmatprep.mubr.msk.f32.mxu0 %vm2211_vm5, %v2210_v38 }
 0x28d   :  { %2040 = vmatprep.subr.mxu0 %v2210_v38 }
 0x28f   :  { %v852_v52 = vpop.permute.xlu1 %851  ;;  %2033 = vmatmul.mubr.msk.f32.vlgmr.msra.gmra.mxu0 %vm166_vm6, %v678_v49  ;;  %v1192_v54 = vpop.permute.xlu0 %1191 }
 0x290   :  { %2041 = vmatpush3.xpose.msk.msra.mxu0 %vm166_vm6, %v852_v52  ;;  %2042 = vmatprep.mubr.msk.f32.mxu0 %vm2211_vm5, %v2210_v38 }
 0x291   :  { %2050 = vmatprep.subr.mxu0 %v2210_v38 }
 0x293   :  { %v1018_v53 = vpop.permute.xlu1 %1017  ;;  %2043 = vmatmul.mubr.msk.f32.vlgmr.msra.gmra.mxu0 %vm166_vm6, %v2328_v43  ;;  %v1364_v56 = vpop.permute.xlu0 %1363 }
 0x294   :  { %2051 = vmatpush3.xpose.msk.msra.mxu0 %vm166_vm6, %v1020_v51  ;;  %2052 = vmatprep.mubr.msk.f32.mxu0 %vm2211_vm5, %v2210_v38 }
 0x295   :  { %2060 = vmatprep.subr.mxu0 %v2210_v38 }
 0x297   :  { %2053 = vmatmul.mubr.msk.f32.vlgmr.msra.gmra.mxu0 %vm166_vm6, %v1018_v53  ;;  %v1190_v55 = vpop.permute.xlu1 %1189 }
 0x298   :  { %2061 = vmatpush3.xpose.msk.msra.mxu0 %vm166_vm6, %v1192_v54  ;;  %2062 = vmatprep.mubr.msk.f32.mxu0 %vm2211_vm5, %v2210_v38 }
 0x299   :  { %2070 = vmatprep.subr.mxu0 %v2210_v38 }
 0x29b   :  { %2063 = vmatmul.mubr.msk.f32.vlgmr.msra.gmra.mxu0 %vm166_vm6, %v1190_v55  ;;  %v1362_v57 = vpop.permute.xlu1 %1361 }
 0x29c   :  { %2071 = vmatpush3.xpose.msk.msra.mxu0 %vm166_vm6, %v1364_v56  ;;  %2072 = vmatprep.mubr.msk.f32.mxu0 %vm2211_vm5, %v2210_v38 }
 0x29f   :  { %2073 = vmatmul.mubr.msk.f32.vlgmr.msra.gmra.mxu0 %vm166_vm6, %v1362_v57 }
 0x343   :  { %v237_v59 = vpop.f32.mrf.mxu1 }
 0x344   :  { %v241_v61 = vmul.f32 0.35355338, %v237_v59  ;;  %v405_v62 = vpop.f32.mrf.mxu0 }
 0x345   :  { %v409_v63 = vmul.f32 0.35355338, %v405_v62  ;;  %v2004_v2 = vpop.f32.mrf.mxu1 }
 0x346   :  { %v2014_v3 = vpop.f32.mrf.mxu0  ;;  %v242_v4 = vadd.f32 %v241_v61, %v27_v60 }
 0x347   :  { %v410_v5 = vadd.f32 %v409_v63, %v27_v60 }
 0x348   :  { %v243_v6 = vsel %vm166_vm6, %v242_v4, -inf }
 0x349   :  { %244 = vmax.xlane.f32.xlu0 %v243_v6  ;;  %v411_v7 = vsel %vm166_vm6, %v410_v5, -inf }
 0x34a   :  { %412 = vmax.xlane.f32.xlu1 %v411_v7 }
 0x34b   :  { %v578_v8 = vpop.f32.mrf.mxu0 }
 0x34c   :  { %v582_v9 = vmul.f32 0.35355338, %v578_v8 }
 0x34d   :  { %v2024_v10 = vpop.f32.mrf.mxu0 }
 0x34e   :  { %v2386_v12 = vadd.f32 %v582_v9, %v27_v60 }
 0x34f   :  { %v751_v13 = vpop.f32.mrf.mxu0 }
 0x350   :  { %v755_v18 = vmul.f32 0.35355338, %v751_v13  ;;  %v584_v19 = vsel %vm166_vm6, %v2386_v12, -inf }
 0x351   :  { %585 = vmax.xlane.f32.xlu0 %v584_v19  ;;  %v2034_v20 = vpop.f32.mrf.mxu0 }
 0x352   :  { %v756_v21 = vadd.f32 %v755_v18, %v27_v60 }
 0x353   :  { %v923_v22 = vpop.f32.mrf.mxu0 }
 0x354   :  { %v927_v24 = vmul.f32 0.35355338, %v923_v22  ;;  %v757_v25 = vsel %vm166_vm6, %v756_v21, -inf }
 0x355   :  { %758 = vmax.xlane.f32.xlu0 %v757_v25  ;;  %v2044_v26 = vpop.f32.mrf.mxu0 }
 0x356   :  { %v2392_v27 = vadd.f32 %v927_v24, %v28_v23 }
 0x357   :  { %v1091_v28 = vpop.f32.mrf.mxu0 }
 0x358   :  { %v1095_v29 = vmul.f32 0.35355338, %v1091_v28  ;;  %v929_v30 = vsel %vm166_vm6, %v2392_v27, -inf }
 0x359   :  { %930 = vmax.xlane.f32.xlu0 %v929_v30  ;;  %v2054_v31 = vpop.f32.mrf.mxu0 }
 0x35a   :  { %v1096_v32 = vadd.f32 %v1095_v29, %v28_v23 }
 0x35b   :  { %v1263_v33 = vpop.f32.mrf.mxu0 }
 0x35c   :  { %v1267_v34 = vmul.f32 0.35355338, %v1263_v33  ;;  %v1097_v35 = vsel %vm166_vm6, %v1096_v32, -inf }
 0x35d   :  { %1098 = vmax.xlane.f32.xlu1 %v1097_v35  ;;  %v2064_v36 = vpop.f32.mrf.mxu0 }
 0x35e   :  { %v1268_v37 = vadd.f32 %v1267_v34, %v28_v23 }
 0x35f   :  { %v1435_v39 = vpop.f32.mrf.mxu0 }
 0x360   :  { %v1269_v41 = vsel %vm166_vm6, %v1268_v37, -inf  ;;  %v1439_v45 = vmul.f32 0.35355338, %v1435_v39 }
 0x361   :  { %1270 = vmax.xlane.f32.xlu0 %v1269_v41  ;;  %v2074_v44 = vpop.f32.mrf.mxu0 }
 0x362   :  { %v1440_v46 = vadd.f32 %v1439_v45, %v28_v23 }
 0x364   :  { %v1441_v47 = vsel %vm166_vm6, %v1440_v46, -inf }
 0x36e   :  { %254 = vrot.lane.b32.xlu1 %v2319_v42, %s2219_s1 }
 0x392   :  { %1442 = vmax.xlane.f32.xlu1 %v1441_v47 }
 0x3a3   :  { %595 = vrot.lane.b32.xlu1 %v2319_v42, %s2220_s17 }
 0x3a7   :  { %768 = vrot.lane.b32.xlu1 %v2319_v42, %s2221_s18 }
 0x3ab   :  { %940 = vrot.lane.b32.xlu1 %v2328_v43, %s2219_s1 }
 0x3d2   :  { %v245_v48 = vpop.xlane.xlu0 %244 }
 0x3d3   :  { %v246_v49 = vsub.f32 %v242_v4, %v245_v48  ;;  %v413_v50 = vpop.xlane.xlu1 %412 }
 0x3d4   :  { %v414_v51 = vsub.f32 %v410_v5, %v413_v50 }
 0x3d5   :  { %v247_v52 = vmul.f32 1.442695, %v246_v49 }
 0x3d6   :  { %v415_v53 = vmul.f32 1.442695, %v414_v51 }
 0x3d7   :  { %2148 = vpow2.f32 %v247_v52 }
 0x3d8   :  { %2150 = vpow2.f32 %v415_v53 }
 0x3da   :  { %v586_v54 = vpop.xlane.xlu0 %585 }
 0x3db   :  { %v587_v4 = vsub.f32 %v2386_v12, %v586_v54 }
 0x3dd   :  { %v588_v6 = vmul.f32 1.442695, %v587_v4 }
 0x3de   :  { %v759_v55 = vpop.xlane.xlu0 %758 }
 0x3df   :  { %v760_v56 = vsub.f32 %v756_v21, %v759_v55 }
 0x3e1   :  { %v761_v57 = vmul.f32 1.442695, %v760_v56 }
 0x3e2   :  { %v931_v5 = vpop.xlane.xlu0 %930 }
 0x3e3   :  { %2152 = vpow2.f32 %v761_v57  ;;  %v932_v7 = vsub.f32 %v2392_v27, %v931_v5 }
 0x3e4   :  { %v2149_v58 = vpop.eup %2148  ;;  %2154 = vpow2.f32 %v588_v6 }
 0x3e5   :  { %v2407_v59 = vpop.eup %2150  ;;  %v249_v60 = vsel %vm166_vm6, %v2149_v58, 0.0  ;;  %v933_v9 = vmul.f32 1.442695, %v932_v7 }
 0x3e6   :  { %v1099_v61 = vpop.xlane.xlu1 %1098  ;;  %250 = vadd.xlane.f32.xlu0 %v249_v60  ;;  %v417_v62 = vsel %vm166_vm6, %v2407_v59, 0.0 }
 0x3e7   :  { %418 = vadd.xlane.f32.xlu1 %v417_v62  ;;  %2156 = vpow2.f32 %v933_v9  ;;  %v1100_v11 = vsub.f32 %v1096_v32, %v1099_v61 }
 0x3e9   :  { %v1101_v18 = vmul.f32 1.442695, %v1100_v11 }
 0x3ea   :  { %v255_v63 = vpop.permute.xlu1 %254  ;;  %v1271_v8 = vpop.xlane.xlu0 %1270 }
 0x3eb   :  { %2006 = vmatpush3.msra.mxu1 %v255_v63  ;;  %v1272_v10 = vsub.f32 %v1268_v37, %v1271_v8 }
 0x3ec   :  { %2015 = vmatprep.subr.mxu1 %v2210_v38 }
 0x3ed   :  { %v1273_v13 = vmul.f32 1.442695, %v1272_v10 }
 0x3ef   :  { %2158 = vpow2.f32 %v1273_v13 }
 0x3f0   :  { %v2413_v2 = vpop.eup %2152  ;;  %2160 = vpow2.f32 %v1101_v18 }
 0x3f1   :  { %v763_v3 = vsel %vm166_vm6, %v2413_v2, 0.0  ;;  %v2155_v19 = vpop.eup %2154 }
 0x3f2   :  { %764 = vadd.xlane.f32.xlu1 %v763_v3 }
 0x3f4   :  { %v2422_v12 = vpop.eup %2156 }
 0x3f5   :  { %v935_v23 = vsel %vm166_vm6, %v2422_v12, 0.0 }
 0x3fc   :  { %422 = vrot.lane.b32.xlu0 %v2319_v42, %s2222_s19  ;;  %v590_v42 = vsel %vm166_vm6, %v2155_v19, 0.0  ;;  %v2426_v24 = vpop.eup %2158 }
 0x3fd   :  { %v1275_v25 = vsel %vm166_vm6, %v2426_v24, 0.0  ;;  %v2161_v26 = vpop.eup %2160 }
 0x3fe   :  { %v1103_v27 = vsel %vm166_vm6, %v2161_v26, 0.0 }
 0x403   :  { %1108 = vrot.lane.b32.xlu1 %v2328_v43, %s2222_s19 }
 0x41b   :  { %v1443_v20 = vpop.xlane.xlu1 %1442  ;;  %591 = vadd.xlane.f32.xlu0 %v590_v42 }
 0x41c   :  { %v1444_v21 = vsub.f32 %v1440_v46, %v1443_v20 }
 0x41e   :  { %v1445_v22 = vmul.f32 1.442695, %v1444_v21 }
 0x41f   :  { %936 = vadd.xlane.f32.xlu0 %v935_v23  ;;  %v596_v30 = vpop.permute.xlu1 %595 }
 0x420   :  { %2162 = vpow2.f32 %v1445_v22 }
 0x423   :  { %1276 = vadd.xlane.f32.xlu0 %v1275_v25  ;;  %v769_v31 = vpop.permute.xlu1 %768 }
 0x427   :  { %1104 = vadd.xlane.f32.xlu1 %v1103_v27  ;;  %v941_v32 = vpop.permute.xlu1 %940 }
 0x42d   :  { %v2431_v28 = vpop.eup %2162 }
 0x42e   :  { %v1447_v29 = vsel %vm166_vm6, %v2431_v28, 0.0 }
 0x42f   :  { %1448 = vadd.xlane.f32.xlu0 %v1447_v29 }
 0x438   :  { %1452 = vrot.lane.b32.xlu1 %v2328_v43, %s2221_s18 }
 0x445   :  { %1280 = vrot.lane.b32.xlu0 %v2328_v43, %s2220_s17 }
 0x46f   :  { %v251_v33 = vpop.xlane.xlu0 %250 }
 0x470   :  { %2164 = vrcp.f32 %v251_v33  ;;  %v419_v34 = vpop.xlane.xlu1 %418 }
 0x471   :  { %2166 = vrcp.f32 %v419_v34 }
 0x473   :  { %v423_v39 = vpop.permute.xlu0 %422 }
 0x47b   :  { %v765_v41 = vpop.xlane.xlu1 %764 }
 0x47d   :  { %v2165_v35 = vpop.eup %2164 }
 0x47e   :  { %v253_v36 = vmul.f32 %v2165_v35, %v2149_v58  ;;  %v2167_v37 = vpop.eup %2166 }
 0x47f   :  { %v421_v43 = vmul.f32 %v2167_v37, %v2407_v59  ;;  %v1109_v46 = vpop.permute.xlu1 %1108 }
 0x480   :  { %2008 = vmatmul.mubr.msk.f32.vlgmr.msra.gmra.mxu1 %vm166_vm6, %v253_v36 }
 0x481   :  { %2016 = vmatpush3.msra.mxu1 %v423_v39  ;;  %2017 = vmatprep.mubr.msk.f32.mxu1 %vm2211_vm5, %v2210_v38 }
 0x482   :  { %2025 = vmatprep.subr.mxu1 %v2210_v38 }
 0x484   :  { %2018 = vmatmul.mubr.msk.f32.vlgmr.msra.gmra.mxu1 %vm166_vm6, %v421_v43 }
 0x485   :  { %2026 = vmatpush3.msra.mxu1 %v596_v30  ;;  %2027 = vmatprep.mubr.msk.f32.mxu1 %vm2211_vm5, %v2210_v38 }
 0x486   :  { %2035 = vmatprep.subr.mxu1 %v2210_v38 }
 0x4a4   :  { %v592_v44 = vpop.xlane.xlu0 %591 }
 0x4a5   :  { %2168 = vrcp.f32 %v592_v44 }
 0x4a6   :  { %2170 = vrcp.f32 %v765_v41 }
 0x4a8   :  { %v937_v45 = vpop.xlane.xlu0 %936 }
 0x4a9   :  { %2172 = vrcp.f32 %v937_v45 }
 0x4ac   :  { %v1277_v47 = vpop.xlane.xlu0 %1276 }
 0x4b0   :  { %v1105_v48 = vpop.xlane.xlu1 %1104 }
 0x4b1   :  { %2174 = vrcp.f32 %v1105_v48  ;;  %v1689_v48 = vld [vmem:[%s2549_s2 + $0x28] sm:$0xff] }
 0x4b2   :  { %v2169_v49 = vpop.eup %2168  ;;  %2176 = vrcp.f32 %v1277_v47  ;;  %v1690_v47 = vld [vmem:[%s2549_s2 + $0x38] sm:$0xff] }
 0x4b3   :  { %v594_v50 = vmul.f32 %v2169_v49, %v2155_v19  ;;  %v2171_v51 = vpop.eup %2170  ;;  %v1688_v49 = vld [vmem:[%s2549_s2 + $0x18] sm:$0xff] }
 0x4b4   :  { %v767_v52 = vmul.f32 %v2171_v51, %v2413_v2  ;;  %v1453_v61 = vpop.permute.xlu1 %1452  ;;  %v1788_v51 = vld [vmem:[%s2550_s3 + $0x38] sm:$0xff] }
 0x4b5   :  { %2028 = vmatmul.mubr.msk.f32.vlgmr.msra.gmra.mxu1 %vm166_vm6, %v594_v50  ;;  %v1687_v50 = vld [vmem:[%s2549_s2 + $0x8] sm:$0xff] }
 0x4b6   :  { %2036 = vmatpush3.msra.mxu1 %v769_v31  ;;  %2037 = vmatprep.mubr.msk.f32.mxu1 %vm2211_vm5, %v2210_v38  ;;  %v2173_v53 = vpop.eup %2172 }
 0x4b7   :  { %2045 = vmatprep.subr.mxu1 %v2210_v38  ;;  %v939_v55 = vmul.f32 %v2173_v53, %v2422_v12  ;;  %v1786_v53 = vld [vmem:[%s2550_s3 + $0x28] sm:$0xff] }
 0x4b8   :  { %v1449_v54 = vpop.xlane.xlu0 %1448 }
 0x4b9   :  { %2178 = vrcp.f32 %v1449_v54  ;;  %2038 = vmatmul.mubr.msk.f32.vlgmr.msra.gmra.mxu1 %vm166_vm6, %v767_v52  ;;  %v1787_v52 = vld [vmem:[%s2550_s3 + $0x30] sm:$0xff]  ;;  %v1785_v54 = vld [vmem:[%s2550_s3 + $0x20] sm:$0xff] }
 0x4ba   :  { %2046 = vmatpush3.msra.mxu1 %v941_v32  ;;  %2047 = vmatprep.mubr.msk.f32.mxu1 %vm2211_vm5, %v2210_v38 }
 0x4bb   :  { %2055 = vmatprep.subr.mxu1 %v2210_v38 }
 0x4bc   :  { %v1281_v59 = vpop.permute.xlu0 %1280 }
 0x4bd   :  { %2048 = vmatmul.mubr.msk.f32.vlgmr.msra.gmra.mxu1 %vm166_vm6, %v939_v55 }
 0x4be   :  { %v2175_v56 = vpop.eup %2174  ;;  %2056 = vmatpush3.msra.mxu1 %v1109_v46  ;;  %2057 = vmatprep.mubr.msk.f32.mxu1 %vm2211_vm5, %v2210_v38 }
 0x4bf   :  { %2065 = vmatprep.subr.mxu1 %v2210_v38  ;;  %v1107_v57 = vmul.f32 %v2175_v56, %v2161_v26  ;;  %v2177_v58 = vpop.eup %2176 }
 0x4c0   :  { %v1279_v60 = vmul.f32 %v2177_v58, %v2426_v24 }
 0x4c1   :  { %2058 = vmatmul.mubr.msk.f32.vlgmr.msra.gmra.mxu1 %vm166_vm6, %v1107_v57 }
 0x4c2   :  { %2066 = vmatpush3.msra.mxu1 %v1281_v59  ;;  %2067 = vmatprep.mubr.msk.f32.mxu1 %vm2211_vm5, %v2210_v38 }
 0x4c3   :  { %2075 = vmatprep.subr.mxu1 %v2210_v38 }
 0x4c5   :  { %2068 = vmatmul.mubr.msk.f32.vlgmr.msra.gmra.mxu1 %vm166_vm6, %v1279_v60 }
 0x4c6   :  { %v2179_v62 = vpop.eup %2178  ;;  %2076 = vmatpush3.msra.mxu1 %v1453_v61  ;;  %2077 = vmatprep.mubr.msk.f32.mxu1 %vm2211_vm5, %v2210_v38 }
 0x4c7   :  { %v1451_v63 = vmul.f32 %v2179_v62, %v2431_v28  ;;  %2091 = vmatprep.subr.mxu1 %v1690_v47 }
 0x4c9   :  { %2078 = vmatmul.mubr.msk.f32.vlgmr.msra.gmra.mxu1 %vm166_vm6, %v1451_v63 }
 0x4ca   :  { %2092 = vmatpush3.msra.mxu1 %v1690_v47 }
 0x4cb   :  { %2093 = vmatprep.subr.mxu1 %v1689_v48 }
 0x4cc   :  { %2094 = vmatpush3.msra.mxu1 %v1689_v48 }
 0x4cd   :  { %2095 = vmatprep.subr.mxu1 %v1688_v49 }
 0x4ce   :  { %2096 = vmatpush3.msra.mxu1 %v1688_v49 }
 0x4cf   :  { %2097 = vmatprep.subr.mxu1 %v1687_v50 }
 0x4d0   :  { %2098 = vmatpush3.msra.mxu1 %v1687_v50 }
 0x540   :  { %v326_v2 = vpop.f32.mrf.mxu1 }
 0x541   :  { %330 = vst.msk [vmem:[#allocation2] sm:$0xff] %vm166_vm6, %v326_v2 }
 0x542   :  { %v2009_v3 = vpop.f32.mrf.mxu1 }
 0x544   :  { %v494_v4 = vpop.f32.mrf.mxu1 }
 0x545   :  { %499 = vrot.lane.b32.xlu0 %v494_v4, %s2223_s20 }
 0x546   :  { %v2019_v5 = vpop.f32.mrf.mxu1 }
 0x575   :  { %v667_v6 = vpop.f32.mrf.mxu1 }
 0x576   :  { %672 = vrot.lane.b32.xlu1 %v667_v6, %s2224_s21 }
 0x577   :  { %v2029_v7 = vpop.f32.mrf.mxu1 }
 0x579   :  { %v840_v8 = vpop.f32.mrf.mxu1 }
 0x57a   :  { %845 = vrot.lane.b32.xlu1 %v840_v8, %s2225_s0 }
 0x57b   :  { %v2039_v38 = vpop.f32.mrf.mxu1 }
 0x57d   :  { %v1012_v9 = vpop.f32.mrf.mxu1 }
 0x57e   :  { %1016 = vst.msk [vmem:[#allocation2 + $0x8] sm:$0xff] %vm166_vm6, %v1012_v9 }
 0x57f   :  { %v2049_v10 = vpop.f32.mrf.mxu1 }
 0x581   :  { %v1180_v11 = vpop.f32.mrf.mxu1 }
 0x582   :  { %1185 = vrot.lane.b32.xlu0 %v1180_v11, %s2223_s20 }
 0x583   :  { %v2059_v13 = vpop.f32.mrf.mxu1 }
 0x584   :  { %v1924_v13 = vld [vmem:[%s2551_s4 + $0x1] ss:$0 sm:$0xff] }
 0x585   :  { %v1352_v18 = vpop.f32.mrf.mxu1 }
 0x586   :  { %1357 = vrot.lane.b32.xlu0 %v1352_v18, %s2224_s21  ;;  %v1784_v18 = vld [vmem:[%s2550_s3 + $0x18] sm:$0xff] }
 0x587   :  { %v2069_v19 = vpop.f32.mrf.mxu1 }
 0x588   :  { %v1783_v19 = vld [vmem:[%s2550_s3 + $0x10] sm:$0xff] }
 0x589   :  { %v1524_v42 = vpop.f32.mrf.mxu1 }
 0x58a   :  { %1529 = vrot.lane.b32.xlu1 %v1524_v42, %s2225_s0  ;;  %1555 = vrot.lane.b32.xlu0 %v2280_v14, %s2226_s22  ;;  %v1782_v42 = vld [vmem:[%s2550_s3 + $0x8] sm:$0xff] }
 0x58b   :  { %v2079_v12 = vpop.f32.mrf.mxu1 }
 0x58c   :  { %v1781_v12 = vld [vmem:[%s2550_s3] sm:$0xff] }
 0x58e   :  { %1553 = vrot.lane.b32.xlu1 %v2285_v15, %s2226_s22  ;;  %1551 = vrot.lane.b32.xlu0 %v2292_v16, %s2226_s22 }
 0x592   :  { %1549 = vrot.lane.b32.xlu1 %v2301_v17, %s2226_s22  ;;  %1561 = vrot.lane.b32.xlu0 %v2316_v40, %s2226_s22 }
 0x5b7   :  { %v500_v20 = vpop.permute.xlu0 %499 }
 0x5b8   :  { %503 = vst.msk [vmem:[#allocation2] sm:$0xff] %vm502_vm9, %v500_v20 }
 0x5e8   :  { %v673_v21 = vpop.permute.xlu1 %672 }
 0x5e9   :  { %676 = vst.msk [vmem:[#allocation2] sm:$0xff] %vm675_vm10, %v673_v21 }
 0x5ec   :  { %v846_v22 = vpop.permute.xlu1 %845 }
 0x5ed   :  { %849 = vst.msk [vmem:[#allocation2] sm:$0xff] %vm848_vm11, %v846_v22 }
 0x5f4   :  { %v1186_v23 = vpop.permute.xlu0 %1185  ;;  %v1533_v14 = vld [vmem:[#allocation2] sm:$0xff] }
 0x5f5   :  { %1188 = vst.msk [vmem:[#allocation2 + $0x8] sm:$0xff] %vm502_vm9, %v1186_v23  ;;  %2088 = vmatprep.mubr.msk.f32.mxu0 %vm29_vm0, %v1533_v14 }
 0x5f8   :  { %v1358_v15 = vpop.permute.xlu0 %1357 }
 0x5f9   :  { %1360 = vst.msk [vmem:[#allocation2 + $0x8] sm:$0xff] %vm675_vm10, %v1358_v15 }
 0x5fc   :  { %v1530_v16 = vpop.permute.xlu1 %1529  ;;  %v1556_v17 = vpop.permute.xlu0 %1555 }
 0x5fd   :  { %1532 = vst.msk [vmem:[#allocation2 + $0x8] sm:$0xff] %vm848_vm11, %v1530_v16  ;;  %2080 = vmatprep.subr.mxu0 %v1556_v17 }
 0x5fe   :  { %2081 = vmatpush3.msra.mxu0 %v1556_v17 }
 0x600   :  { %v1554_v40 = vpop.permute.xlu1 %1553  ;;  %v1552_v24 = vpop.permute.xlu0 %1551 }
 0x601   :  { %2082 = vmatprep.subr.mxu0 %v1554_v40 }
 0x602   :  { %2083 = vmatpush3.msra.mxu0 %v1554_v40 }
 0x603   :  { %2084 = vmatprep.subr.mxu0 %v1552_v24 }
 0x604   :  { %v1550_v25 = vpop.permute.xlu1 %1549  ;;  %2085 = vmatpush3.msra.mxu0 %v1552_v24  ;;  %v1534_v26 = vld [vmem:[#allocation2 + $0x8] sm:$0xff]  ;;  %v1562_v27 = vpop.permute.xlu0 %1561 }
 0x605   :  { %2086 = vmatprep.subr.mxu0 %v1550_v25 }
 0x606   :  { %2087 = vmatpush3.msra.mxu0 %v1550_v25 }
 0x607   :  { %2089 = vmatmul.mubr.msk.f32.vlgmr.msra.gmra.mxu0 %vm29_vm0, %v1534_v26  ;;  %2102 = vmatprep.subr.mxu0 %v1788_v51 }
 0x608   :  { %2103 = vmatpush3.msra.mxu0 %v1788_v51 }
 0x609   :  { %2104 = vmatprep.subr.mxu0 %v1787_v52 }
 0x60a   :  { %2105 = vmatpush3.msra.mxu0 %v1787_v52 }
 0x60b   :  { %2106 = vmatprep.subr.mxu0 %v1786_v53 }
 0x60c   :  { %2107 = vmatpush3.msra.mxu0 %v1786_v53 }
 0x60d   :  { %2108 = vmatprep.subr.mxu0 %v1785_v54 }
 0x60e   :  { %2109 = vmatpush3.msra.mxu0 %v1785_v54 }
 0x60f   :  { %2110 = vmatprep.subr.mxu0 %v1784_v18 }
 0x610   :  { %2111 = vmatpush3.msra.mxu0 %v1784_v18 }
 0x611   :  { %2112 = vmatprep.subr.mxu0 %v1783_v19 }
 0x612   :  { %2113 = vmatpush3.msra.mxu0 %v1783_v19 }
 0x613   :  { %2114 = vmatprep.subr.mxu0 %v1782_v42 }
 0x614   :  { %2115 = vmatpush3.msra.mxu0 %v1782_v42 }
 0x615   :  { %2116 = vmatprep.subr.mxu0 %v1781_v12 }
 0x616   :  { %2117 = vmatpush3.msra.mxu0 %v1781_v12 }
 0x6c7   :  { %v2090_v28 = vpop.f32.mrf.mxu0 }
 0x6c8   :  { %v1642_v29 = vadd.f32 %v2090_v28, %v1562_v27 }
 0x6c9   :  { %v1636_v30 = vpop.f32.mrf.mxu0 }
 0x6ca   :  { %v2484_v31 = vadd.f32 %v1642_v29, %v2267_v1  ;;  %v1637_v32 = vadd.f32 %v1636_v30, %v1562_v27 }
 0x6cc   :  { %v2487_v33 = vadd.f32 %v1637_v32, %v2262_v0  ;;  %v1650_v34 = vsel %vm29_vm0, %v2484_v31, 0.0 }
 0x6cd   :  { %1651 = vadd.xlane.f32.xlu0 %v1650_v34 }
 0x6ce   :  { %v1647_v35 = vsel %vm29_vm0, %v2487_v33, 0.0 }
 0x6cf   :  { %1648 = vadd.xlane.f32.xlu1 %v1647_v35 }
 0x6e0   :  { %1789 = vrot.lane.b32.xlu1 %v1924_v13, %s2219_s1  ;;  %s2227_s1 = smov [#allocation3]  }
 0x6e1   :  { %s1883_s22 = sshll.u32 %s2227_s1, 4  ;;  %s1884_s22 = int_to_ptr.vmem [resolvable:$true] %s1883_s22 }
 0x6e2   :  { %s2188_s3 = scalar_lea.vmem %s1884_s22, 256  ;;  %p2193_p1 = scmp.lt.s32.totalorder %s1884_s22, %s1884_s22 }
 0x6e3   :  { %p2189_p0 = scmp.ne.s32.totalorder %s1884_s22, %s2188_s3  ;;  %p2194_p2 = scmp.lt.s32.totalorder %s2188_s3, %s2188_s3 }
 0x6e5   :  { %p2195_p3 = por %p2194_p2, %p2193_p1 }
 0x6e7   :  { %p2196_p4 = pnand %p2195_p3, %p2189_p0 }
 0x756   :  { %v1652_v36 = vpop.xlane.xlu0 %1651 }
 0x757   :  { %v1654_v37 = vmul.f32 0.03125, %v1652_v36 }
 0x758   :  { %v1649_v39 = vpop.xlane.xlu1 %1648 }
 0x759   :  { %v1653_v43 = vmul.f32 0.03125, %v1649_v39  ;;  %v1656_v41 = vsub.f32 %v2484_v31, %v1654_v37 }
 0x75b   :  { %v1655_v1 = vsub.f32 %v2487_v33, %v1653_v43  ;;  %v1658_v45 = vmul.f32 %v1656_v41, %v1656_v41 }
 0x75c   :  { %v1790_v16 = vpop.permute.xlu1 %1789 }
 0x75d   :  { %v1657_v44 = vmul.f32 %v1655_v1, %v1655_v1  ;;  %v1662_v46 = vsel %vm29_vm0, %v1658_v45, 0.0 }
 0x75f   :  { %v1659_v0 = vsel %vm29_vm0, %v1657_v44, 0.0 }
 0x760   :  { %1660 = vadd.xlane.f32.xlu0 %v1659_v0 }
 0x764   :  { %1663 = vadd.xlane.f32.xlu0 %v1662_v46 }
 0x7e9   :  { %v1661_v55 = vpop.xlane.xlu0 %1660 }
 0x7ea   :  { %v1665_v56 = vmul.f32 0.032258064, %v1661_v55 }
 0x7ec   :  { %2180 = vrsqrt.f32 %v1665_v56  ;;  %vm1669_vm12 = vcmp.eq.f32.partialorder %v1665_v56, inf  ;;  %v1672_v61 = vand.u32 2147483648, %v1665_v56  ;;  %vm1671_vm13 = vcmp.eq.f32.partialorder %v1665_v56, 0.0 }
 0x7ed   :  { %v1664_v57 = vpop.xlane.xlu0 %1663 }
 0x7ee   :  { %v1666_v58 = vmul.f32 0.032258064, %v1664_v57 }
 0x7f0   :  { %2182 = vrsqrt.f32 %v1666_v58  ;;  %vm1676_vm14 = vcmp.eq.f32.partialorder %v1666_v58, inf  ;;  %v1679_v5 = vand.u32 2147483648, %v1666_v58  ;;  %vm1678_vm15 = vcmp.eq.f32.partialorder %v1666_v58, 0.0 }
 0x7f9   :  { %v2181_v59 = vpop.eup %2180 }
 0x7fa   :  { %v1668_v60 = vmul.f32 %v2181_v59, %v1665_v56 }
 0x7fc   :  { %v1670_v62 = vsel %vm1669_vm12, %v1665_v56, %v1668_v60 }
 0x7fd   :  { %v2183_v63 = vpop.eup %2182  ;;  %v1673_v2 = vsel %vm1671_vm13, %v1672_v61, %v1670_v62 }
 0x7fe   :  { %v1681_v3 = vadd.f32 1e-06, %v1673_v2  ;;  %v1675_v4 = vmul.f32 %v2183_v63, %v1666_v58 }
 0x800   :  { %v1677_v6 = vsel %vm1676_vm14, %v1666_v58, %v1675_v4  ;;  %2184 = vrcp.f32 %v1681_v3 }
 0x801   :  { %v1680_v7 = vsel %vm1678_vm15, %v1679_v5, %v1677_v6 }
 0x802   :  { %v1682_v8 = vadd.f32 1e-06, %v1680_v7 }
 0x804   :  { %2186 = vrcp.f32 %v1682_v8 }
 0x80d   :  { %v2185_v38 = vpop.eup %2184 }
 0x80e   :  { %v1685_v9 = vmul.f32 %v2185_v38, %v1655_v1 }
 0x810   :  { %2099 = vmatprep.mubr.msk.f32.mxu1 %vm29_vm0, %v1685_v9 }
 0x811   :  { %v2187_v10 = vpop.eup %2186 }
 0x812   :  { %v1686_v11 = vmul.f32 %v2187_v10, %v1656_v41 }
 0x814   :  { %2100 = vmatmul.mubr.msk.f32.vlgmr.msra.gmra.mxu1 %vm29_vm0, %v1686_v11 }
 0x8d4   :  { %v2101_v20 = vpop.f32.mrf.mxu1 }
 0x8d5   :  { %v1776_v21 = vadd.f32 %v2101_v20, %v1924_v13 }
 0x8d6   :  { %v1770_v22 = vpop.f32.mrf.mxu1 }
 0x8d7   :  { %v1771_v23 = vadd.f32 %v1924_v13, %v1770_v22  ;;  %v1780_v15 = vmax.f32 %v1776_v21, 0.0 }
 0x8d9   :  { %v1779_v14 = vmax.f32 %v1771_v23, 0.0 }
 0x8db   :  { %2118 = vmatprep.mubr.msk.f32.mxu0 %vm1792_vm1, %v1779_v14 }
 0x8dc   :  { %2119 = vmatmul.mubr.msk.f32.vlgmr.msra.gmra.mxu0 %vm1792_vm1, %v1780_v15 }
 0x99c   :  { %v2120_v17 = vpop.f32.mrf.mxu0 }
 0x99d   :  { %v1871_v40 = vadd.f32 %v2120_v17, %v1790_v16 }
 0x99e   :  { %v1865_v24 = vpop.f32.mrf.mxu0 }
 0x99f   :  { %v1875_v25 = vadd.f32 %v1871_v40, %v2484_v31  ;;  %v1866_v26 = vadd.f32 %v1865_v24, %v1790_v16 }
 0x9a1   :  { %1877 = vst.msk [vmem:[#allocation3 + $0x8] sm:$0xff] %vm29_vm0, %v1875_v25  ;;  %v1874_v27 = vadd.f32 %v1866_v26, %v2487_v33 }
 0x9a3   :  { %1876 = vst.msk [vmem:[#allocation3] sm:$0xff] %vm29_vm0, %v1874_v27 }
 0x9a4   :  { %2199 = shalt.err (!%p2196_p4)
}
 0x9a5   :  { %s2228_s23 = smov 128  }
 0x9a6   :  { %1889 = dma.vmem_to_hbm [thread:$0]  %s1884_s22, 256, %s2552_s5, [#allocation4], %s2228_s23, %s2228_s23, %s2223_s20  }
 0x9a7   :  { %2208 = dma.done.wait [#allocation4], 256  }
 0x9a8   :  { %2209 = vsyncadd [#allocation4], 4294967040 }
 0x9a9   :  { %1893 = vsyncpa [#allocation4], 1 }

</bundles_post_ra>
